<compile_context>
chip_gen: v6e
topology: v6e:2x2x1
jax: 0.10.0
libtpu: 0.0.40
codegen_flags: <defaults>
</compile_context>

<pallas_src>
import functools
from math import ceil

import jax
import jax.numpy as jnp
from jax.experimental import pallas as pl
from jax.experimental.pallas import tpu as pltpu

LANE = 128          # lane width: last-dim padding granularity
TILE_B_MIN = 16     # bf16 sublane packing: row-tile granularity
TILE_B_LARGE = 512  # large-batch row tile (sweepable; 256-512 per review)


def _round_up(x, m):
    return ((x + m - 1) // m) * m


# ----------------------------------------------------------------------------
# Fused Pallas kernel: x -> L0 -> ReLU -> L1 -> ReLU -> ... -> L_{n-1}
# The activation never leaves the chip between layers; all matmuls run on the
# MXU with bf16 operands and f32 accumulation.
# ----------------------------------------------------------------------------
def _fused_mlp_kernel(x_ref, *rest, num_layers):
    w_refs = rest[:num_layers]          # pre-transposed, zero-padded bf16 [Din_l, Dout_l]
    o_ref = rest[num_layers]
    y = x_ref[...]                      # (TB, Din_0) f32
    for l in range(num_layers):         # unrolled at trace time
        y = jnp.dot(y.astype(jnp.bfloat16), w_refs[l][...],
                    preferred_element_type=jnp.float32)
        if l < num_layers - 1:
            y = jnp.maximum(y, 0.0)     # fused ReLU on the f32 accumulator
    o_ref[...] = y.astype(o_ref.dtype)  # lane-dense (multiple-of-128) unmasked store


# ----------------------------------------------------------------------------
# One-time weight prep: transpose [out,in] -> [in,out], zero-pad each layer to
# its own [round_up(d_in,128), round_up(d_out,128)] and cast to bf16.
# ----------------------------------------------------------------------------
def prep_weights(weights):
    padded = []
    for w in weights:
        d_out, d_in = w.shape
        din_p, dout_p = _round_up(d_in, LANE), _round_up(d_out, LANE)
        wt = jnp.zeros((din_p, dout_p), jnp.bfloat16)
        wt = wt.at[:d_in, :d_out].set(w.T.astype(jnp.bfloat16))
        padded.append(wt)
    return padded


def _batch_tiling(B):
    """Return (TB, B_pad). Tiles are multiples of 16 rows (bf16 packing)."""
    b_pad = _round_up(B, TILE_B_MIN)
    if b_pad <= TILE_B_MIN:
        return TILE_B_MIN, TILE_B_MIN                     # single tiny step
    if b_pad <= 2 * TILE_B_LARGE:
        tb = _round_up((b_pad + 1) // 2, TILE_B_MIN)      # >=2 parallel steps (v7x: 2 TCs)
        return tb, 2 * tb
    return TILE_B_LARGE, _round_up(b_pad, TILE_B_LARGE)   # big tiles amortize step cost


# ----------------------------------------------------------------------------
# Fused MLP forward
# ----------------------------------------------------------------------------
def mlp_forward(x, padded_wts, out_dim, *, single_buffer_weights=True):
    """x: [B, d_in] f32 (unpadded). padded_wts: per-layer bf16 [Din_pad, Dout_pad],
    pre-transposed. Returns [B, out_dim] f32."""
    num_layers = len(padded_wts)
    B, d_in = x.shape
    din0_p = padded_wts[0].shape[0]
    dout_last_p = padded_wts[-1].shape[1]

    TB, B_pad = _batch_tiling(B)

    # Zero-pad the activation once (padded rows/cols are zero, padded weight
    # rows/cols are zero and ReLU(0)=0, so the math is exact).
    x_pad = jnp.zeros((B_pad, din0_p), jnp.float32).at[:B, :d_in].set(x)

    # --- VMEM budget ---------------------------------------------------------
    weight_bufs = 1 if single_buffer_weights else 2
    weight_bytes = sum(int(w.size) * 2 for w in padded_wts)          # bf16
    resident_weight_bytes = weight_bufs * weight_bytes
    if resident_weight_bytes > 48 * 1024 * 1024:
        # TODO(synk): stream weights layer-by-layer (extra grid axis or
        # pltpu.emit_pipeline with manual copies) once the all-resident
        # footprint no longer fits v7x's 64 MiB VMEM.
        raise ValueError("resident weights exceed the fused-kernel VMEM budget")
    max_width = max(max(w.shape[1] for w in padded_wts), din0_p)
    act_bytes = 2 * TB * max_width * 4                               # f32 working activations
    io_bytes = 2 * TB * din0_p * 4 + 2 * TB * dout_last_p * 4        # double-buffered x / out
    vmem_needed = resident_weight_bytes + act_bytes + io_bytes
    vmem_limit = max(32 * 1024 * 1024,
                     min(int(vmem_needed * 1.25) + (2 << 20), 96 * 1024 * 1024))

    # --- specs ---------------------------------------------------------------
    if single_buffer_weights:
        # Constant block index -> never re-fetched; single buffer halves VMEM.
        w_specs = [pl.BlockSpec(w.shape, lambda i: (0, 0),
                                pipeline_mode=pl.Buffered(1)) for w in padded_wts]
    else:
        w_specs = [pl.BlockSpec(w.shape, lambda i: (0, 0)) for w in padded_wts]

    flops = 2 * B_pad * sum(w.shape[0] * w.shape[1] for w in padded_wts)
    bytes_accessed = int(x_pad.size) * 4 + weight_bytes + B_pad * dout_last_p * 4
    cost = pl.CostEstimate(flops=flops, transcendentals=0,
                           bytes_accessed=bytes_accessed)

    kernel = functools.partial(_fused_mlp_kernel, num_layers=num_layers)
    out = pl.pallas_call(
        kernel,
        out_shape=jax.ShapeDtypeStruct((B_pad, dout_last_p), jnp.float32),
        grid=(B_pad // TB,),
        in_specs=[pl.BlockSpec((TB, din0_p), lambda i: (i, 0))] + w_specs,
        out_specs=pl.BlockSpec((TB, dout_last_p), lambda i: (i, 0)),
        compiler_params=pltpu.CompilerParams(
            dimension_semantics=("parallel",),   # batch tiles shard across TCs (v7x)
            vmem_limit_bytes=vmem_limit,
        ),
        cost_estimate=cost,
    )(x_pad, *padded_wts)
    return out[:B, :out_dim]


# ----------------------------------------------------------------------------
# Deterministic "LLortho" initialization (mirrors MLP.initialize), PyTorch
# Linear weight convention [out_features, in_features].
# ----------------------------------------------------------------------------
def _orthogonal(key, rows, cols):
    transpose = rows < cols
    r_, c_ = (cols, rows) if transpose else (rows, cols)
    a = jax.random.normal(key, (r_, c_), dtype=jnp.float32)
    q, r = jnp.linalg.qr(a)
    q = q * jnp.sign(jnp.diag(r))[None, :]
    if transpose:
        q = q.T
    return q[:rows, :cols]


def make_llortho_weights(key, num_layers, dims):
    keys = jax.random.split(key, num_layers)
    weights = []
    for l in range(num_layers):
        d_out, d_in = dims[l + 1], dims[l]
        if l == 0:
            sub = _orthogonal(keys[l], ceil(d_out / 2), d_in)
            w = jnp.concatenate([sub, -sub], axis=0)
        elif l == num_layers - 1:
            sub = _orthogonal(keys[l], d_out, ceil(d_in / 2))
            w = jnp.concatenate([sub, -sub], axis=1)
        else:
            sub = _orthogonal(keys[l], ceil(d_out / 2), ceil(d_in / 2))
            sub = jnp.concatenate([sub, -sub], axis=0)
            w = jnp.concatenate([sub, -sub], axis=1)
        weights.append(w[:d_out, :d_in].astype(jnp.float32))
    return weights


# ----------------------------------------------------------------------------
if __name__ == "__main__":
    key = jax.random.PRNGKey(0)
    k_w, k_x = jax.random.split(key)

    num_layers = 3
    dims = [16, 32, 32, 8]      # dims[j] -> dims[j+1] per layer
    batch = 4

    # Build weights in PyTorch convention, then prepare them ONCE for the kernel.
    weights = make_llortho_weights(k_w, num_layers, dims)
    padded_wts = prep_weights(weights)

    x = jax.random.normal(k_x, (batch, dims[0]), dtype=jnp.float32)

    fwd = jax.jit(functools.partial(mlp_forward, out_dim=dims[-1]))
    try:
        out = jax.block_until_ready(fwd(x, padded_wts))
    except Exception:
        # This jax version rejects single-buffered weight BlockSpecs -> retry
        # with the default double-buffered specs (correctness unchanged).
        fwd = jax.jit(functools.partial(mlp_forward, out_dim=dims[-1],
                                        single_buffer_weights=False))
        out = jax.block_until_ready(fwd(x, padded_wts))

    # sanity check against plain-JAX f32 reference (unpadded, un-fused).
    # bf16 MXU operands (f32 accumulation) -> loosened tolerance vs f32 math.
    ref = x
    for l in range(num_layers):
        ref = ref @ weights[l].T
        if l < num_layers - 1:
            ref = jnp.maximum(ref, 0.0)
    assert out.shape == (batch, dims[-1])
    assert jnp.allclose(out, ref, atol=5e-2, rtol=5e-2)

    print("KERNEL_OK")
</pallas_src>

<mosaic_0001>
module attributes {stable_mosaic.version = 11 : i64} {
  func.func @_fused_mlp_kernel(%arg0: i32, %arg1: memref<16x128xf32, #tpu.memory_space<vmem>>, %arg2: memref<128x128xbf16, #tpu.memory_space<vmem>>, %arg3: memref<128x128xbf16, #tpu.memory_space<vmem>>, %arg4: memref<128x128xbf16, #tpu.memory_space<vmem>>, %arg5: memref<16x128xf32, #tpu.memory_space<vmem>>) attributes {dimension_semantics = [#tpu.dimension_semantics<parallel>], iteration_bounds = array<i64: 1>, scalar_prefetch = 0 : i64, scratch_operands = 0 : i64, tpu.core_type = #tpu.core_type<tc>, window_params = [{transform_indices = @transform_0, window_bounds = array<i64: 16, 128>}, {pipeline_mode = #tpu.pipeline_mode<synchronous>, transform_indices = @transform_1, window_bounds = array<i64: 128, 128>}, {pipeline_mode = #tpu.pipeline_mode<synchronous>, transform_indices = @transform_2, window_bounds = array<i64: 128, 128>}, {pipeline_mode = #tpu.pipeline_mode<synchronous>, transform_indices = @transform_3, window_bounds = array<i64: 128, 128>}, {transform_indices = @transform_4, window_bounds = array<i64: 16, 128>}]} {
    %c0 = arith.constant 0 : index
    %c0_0 = arith.constant 0 : index
    %0 = vector.load %arg1[%c0, %c0_0] : memref<16x128xf32, #tpu.memory_space<vmem>>, vector<16x128xf32>
    %1 = arith.truncf %0 : vector<16x128xf32> to vector<16x128xbf16>
    %c0_1 = arith.constant 0 : index
    %c0_2 = arith.constant 0 : index
    %2 = vector.load %arg2[%c0_1, %c0_2] : memref<128x128xbf16, #tpu.memory_space<vmem>>, vector<128x128xbf16>
    %cst = arith.constant dense<0.000000e+00> : vector<16x128xf32>
    %3 = tpu.matmul %1, %2, %cst {dimension_numbers = #tpu.dot_dimension_numbers<[1], [0], [0], [1], [0, 0, 1, 1], [], []>} : vector<16x128xbf16>, vector<128x128xbf16>, vector<16x128xf32> -> vector<16x128xf32>
    %cst_3 = arith.constant 0.000000e+00 : f32
    %4 = vector.broadcast %cst_3 : f32 to vector<16x128xf32>
    %5 = arith.maximumf %3, %4 : vector<16x128xf32>
    %6 = arith.truncf %5 : vector<16x128xf32> to vector<16x128xbf16>
    %c0_4 = arith.constant 0 : index
    %c0_5 = arith.constant 0 : index
    %7 = vector.load %arg3[%c0_4, %c0_5] : memref<128x128xbf16, #tpu.memory_space<vmem>>, vector<128x128xbf16>
    %cst_6 = arith.constant dense<0.000000e+00> : vector<16x128xf32>
    %8 = tpu.matmul %6, %7, %cst_6 {dimension_numbers = #tpu.dot_dimension_numbers<[1], [0], [0], [1], [0, 0, 1, 1], [], []>} : vector<16x128xbf16>, vector<128x128xbf16>, vector<16x128xf32> -> vector<16x128xf32>
    %cst_7 = arith.constant 0.000000e+00 : f32
    %9 = vector.broadcast %cst_7 : f32 to vector<16x128xf32>
    %10 = arith.maximumf %8, %9 : vector<16x128xf32>
    %11 = arith.truncf %10 : vector<16x128xf32> to vector<16x128xbf16>
    %c0_8 = arith.constant 0 : index
    %c0_9 = arith.constant 0 : index
    %12 = vector.load %arg4[%c0_8, %c0_9] : memref<128x128xbf16, #tpu.memory_space<vmem>>, vector<128x128xbf16>
    %cst_10 = arith.constant dense<0.000000e+00> : vector<16x128xf32>
    %13 = tpu.matmul %11, %12, %cst_10 {dimension_numbers = #tpu.dot_dimension_numbers<[1], [0], [0], [1], [0, 0, 1, 1], [], []>} : vector<16x128xbf16>, vector<128x128xbf16>, vector<16x128xf32> -> vector<16x128xf32>
    %c0_11 = arith.constant 0 : index
    %c0_12 = arith.constant 0 : index
    %14 = vector.load %arg5[%c0_11, %c0_12] : memref<16x128xf32, #tpu.memory_space<vmem>>, vector<16x128xf32>
    tpu.vector_store %arg5[%c0_11, %c0_12], %13 {strides = array<i32>} : memref<16x128xf32, #tpu.memory_space<vmem>>, vector<16x128xf32>,
    return
  }
  func.func @transform_0(%arg0: i32) -> (i32, i32) {
    %c0_i32 = arith.constant 0 : i32
    %c0_i32_0 = arith.constant 0 : i32
    return %arg0, %c0_i32 : i32, i32
  }
  func.func @transform_1(%arg0: i32) -> (i32, i32) {
    %c0_i32 = arith.constant 0 : i32
    %c0_i32_0 = arith.constant 0 : i32
    %c0_i32_1 = arith.constant 0 : i32
    return %c0_i32, %c0_i32_0 : i32, i32
  }
  func.func @transform_2(%arg0: i32) -> (i32, i32) {
    %c0_i32 = arith.constant 0 : i32
    %c0_i32_0 = arith.constant 0 : i32
    %c0_i32_1 = arith.constant 0 : i32
    return %c0_i32, %c0_i32_0 : i32, i32
  }
  func.func @transform_3(%arg0: i32) -> (i32, i32) {
    %c0_i32 = arith.constant 0 : i32
    %c0_i32_0 = arith.constant 0 : i32
    %c0_i32_1 = arith.constant 0 : i32
    return %c0_i32, %c0_i32_0 : i32, i32
  }
  func.func @transform_4(%arg0: i32) -> (i32, i32) {
    %c0_i32 = arith.constant 0 : i32
    %c0_i32_0 = arith.constant 0 : i32
    return %arg0, %c0_i32 : i32, i32
  }
}

module attributes {stable_mosaic.version = 11 : i64} {
  func.func @_fused_mlp_kernel(%arg0: i32, %arg1: memref<16x128xf32, #tpu.memory_space<vmem>>, %arg2: memref<128x128xbf16, #tpu.memory_space<vmem>>, %arg3: memref<128x128xbf16, #tpu.memory_space<vmem>>, %arg4: memref<128x128xbf16, #tpu.memory_space<vmem>>, %arg5: memref<16x128xf32, #tpu.memory_space<vmem>>) attributes {dimension_semantics = [#tpu.dimension_semantics<parallel>], iteration_bounds = array<i64: 1>, scalar_prefetch = 0 : i64, scratch_operands = 0 : i64, tpu.core_type = #tpu.core_type<tc>, window_params = [{transform_indices = @transform_0, window_bounds = array<i64: 16, 128>}, {pipeline_mode = #tpu.pipeline_mode<synchronous>, transform_indices = @transform_1, window_bounds = array<i64: 128, 128>}, {pipeline_mode = #tpu.pipeline_mode<synchronous>, transform_indices = @transform_2, window_bounds = array<i64: 128, 128>}, {pipeline_mode = #tpu.pipeline_mode<synchronous>, transform_indices = @transform_3, window_bounds = array<i64: 128, 128>}, {transform_indices = @transform_4, window_bounds = array<i64: 16, 128>}]} {
    %c0 = arith.constant 0 : index
    %c0_0 = arith.constant 0 : index
    %0 = vector.load %arg1[%c0, %c0_0] : memref<16x128xf32, #tpu.memory_space<vmem>>, vector<16x128xf32>
    %1 = arith.truncf %0 : vector<16x128xf32> to vector<16x128xbf16>
    %c0_1 = arith.constant 0 : index
    %c0_2 = arith.constant 0 : index
    %2 = vector.load %arg2[%c0_1, %c0_2] : memref<128x128xbf16, #tpu.memory_space<vmem>>, vector<128x128xbf16>
    %cst = arith.constant dense<0.000000e+00> : vector<16x128xf32>
    %3 = tpu.matmul %1, %2, %cst {dimension_numbers = #tpu.dot_dimension_numbers<[1], [0], [0], [1], [0, 0, 1, 1], [], []>} : vector<16x128xbf16>, vector<128x128xbf16>, vector<16x128xf32> -> vector<16x128xf32>
    %cst_3 = arith.constant 0.000000e+00 : f32
    %4 = vector.broadcast %cst_3 : f32 to vector<16x128xf32>
    %5 = arith.maximumf %3, %4 : vector<16x128xf32>
    %6 = arith.truncf %5 : vector<16x128xf32> to vector<16x128xbf16>
    %c0_4 = arith.constant 0 : index
    %c0_5 = arith.constant 0 : index
    %7 = vector.load %arg3[%c0_4, %c0_5] : memref<128x128xbf16, #tpu.memory_space<vmem>>, vector<128x128xbf16>
    %cst_6 = arith.constant dense<0.000000e+00> : vector<16x128xf32>
    %8 = tpu.matmul %6, %7, %cst_6 {dimension_numbers = #tpu.dot_dimension_numbers<[1], [0], [0], [1], [0, 0, 1, 1], [], []>} : vector<16x128xbf16>, vector<128x128xbf16>, vector<16x128xf32> -> vector<16x128xf32>
    %cst_7 = arith.constant 0.000000e+00 : f32
    %9 = vector.broadcast %cst_7 : f32 to vector<16x128xf32>
    %10 = arith.maximumf %8, %9 : vector<16x128xf32>
    %11 = arith.truncf %10 : vector<16x128xf32> to vector<16x128xbf16>
    %c0_8 = arith.constant 0 : index
    %c0_9 = arith.constant 0 : index
    %12 = vector.load %arg4[%c0_8, %c0_9] : memref<128x128xbf16, #tpu.memory_space<vmem>>, vector<128x128xbf16>
    %cst_10 = arith.constant dense<0.000000e+00> : vector<16x128xf32>
    %13 = tpu.matmul %11, %12, %cst_10 {dimension_numbers = #tpu.dot_dimension_numbers<[1], [0], [0], [1], [0, 0, 1, 1], [], []>} : vector<16x128xbf16>, vector<128x128xbf16>, vector<16x128xf32> -> vector<16x128xf32>
    %c0_11 = arith.constant 0 : index
    %c0_12 = arith.constant 0 : index
    %14 = vector.load %arg5[%c0_11, %c0_12] : memref<16x128xf32, #tpu.memory_space<vmem>>, vector<16x128xf32>
    tpu.vector_store %arg5[%c0_11, %c0_12], %13 {strides = array<i32>} : memref<16x128xf32, #tpu.memory_space<vmem>>, vector<16x128xf32>,
    return
  }
  func.func @transform_0(%arg0: i32) -> (i32, i32) {
    %c0_i32 = arith.constant 0 : i32
    %c0_i32_0 = arith.constant 0 : i32
    return %arg0, %c0_i32 : i32, i32
  }
  func.func @transform_1(%arg0: i32) -> (i32, i32) {
    %c0_i32 = arith.constant 0 : i32
    %c0_i32_0 = arith.constant 0 : i32
    %c0_i32_1 = arith.constant 0 : i32
    return %c0_i32, %c0_i32_0 : i32, i32
  }
  func.func @transform_2(%arg0: i32) -> (i32, i32) {
    %c0_i32 = arith.constant 0 : i32
    %c0_i32_0 = arith.constant 0 : i32
    %c0_i32_1 = arith.constant 0 : i32
    return %c0_i32, %c0_i32_0 : i32, i32
  }
  func.func @transform_3(%arg0: i32) -> (i32, i32) {
    %c0_i32 = arith.constant 0 : i32
    %c0_i32_0 = arith.constant 0 : i32
    %c0_i32_1 = arith.constant 0 : i32
    return %c0_i32, %c0_i32_0 : i32, i32
  }
  func.func @transform_4(%arg0: i32) -> (i32, i32) {
    %c0_i32 = arith.constant 0 : i32
    %c0_i32_0 = arith.constant 0 : i32
    return %arg0, %c0_i32 : i32, i32
  }
}

</mosaic_0001>

<bundles_post_ra>
// kernel: mlp_forward.1
= control target key start
LH: loop header
LB: loop body
LE: loop exit
PB: predicated region body
PF: predicated region fallthrough
CT: control target
= control target key end

     0   :  { %9 = vsyncpa [#allocation3], 0  ;;  %s680_s0 = inlined_call_operand.vmem [shape: f32[16,128], index: 0, kind: input, shape index: {}]   ;;  %s681_s1 = inlined_call_operand.hbm [shape: bf16[128,128], index: 1, kind: input, shape index: {}]   ;;  %s682_s2 = inlined_call_operand.hbm [shape: bf16[128,128], index: 2, kind: input, shape index: {}]   ;;  %s683_s3 = inlined_call_operand.hbm [shape: bf16[128,128], index: 3, kind: input, shape index: {}]   ;;  %s684_s4 = inlined_call_operand.vmem [shape: f32[16,128], index: 4, kind: output, shape index: {}]  }
   0x1   :  { %10 = vsyncpa [#allocation5], 0  ;;  %s597_s15 = smov [#allocation4]   ;;  %s598_s17 = smov [#allocation2]  }
   0x2   :  { %s30_s16 = sshll.u32 %s597_s15, 4  ;;  %s18_s18 = sshll.u32 %s598_s17, 4  ;;  %s31_s16 = int_to_ptr.vmem [resolvable:$true] %s30_s16  ;;  %s19_s18 = int_to_ptr.vmem [resolvable:$true] %s18_s18 }
   0x3   :  { %s541_s19 = scalar_lea.vmem %s31_s16, 1024  ;;  %p546_p1 = scmp.lt.s32.totalorder %s31_s16, %s31_s16 }
   0x4   :  { %p542_p0 = scmp.ne.s32.totalorder %s31_s16, %s541_s19  ;;  %p547_p2 = scmp.lt.s32.totalorder %s541_s19, %s541_s19 }
   0x6   :  { %p548_p3 = por %p547_p2, %p546_p1 }
   0x8   :  { %p549_p4 = pnand %p548_p3, %p542_p0 }
   0xa   :  { %552 = shalt.err (!%p549_p4)
}
   0xb   :  { %s599_s20 = smov 64   ;;  %s600_s21 = smov 4  }
   0xc   :  { %36 = dma.hbm_to_vmem [thread:$0]  %s682_s2, 1024, %s31_s16, [#allocation5], %s599_s20, %s599_s20, %s600_s21  }
   0xd   :  { %s561_s24 = scalar_lea.vmem %s19_s18, 1024  ;;  %p566_p6 = scmp.lt.s32.totalorder %s19_s18, %s19_s18 }
   0xe   :  { %p562_p5 = scmp.ne.s32.totalorder %s19_s18, %s561_s24  ;;  %p567_p7 = scmp.lt.s32.totalorder %s561_s24, %s561_s24 }
  0x10   :  { %p568_p8 = por %p567_p7, %p566_p6 }
  0x12   :  { %p569_p9 = pnand %p568_p8, %p562_p5 }
  0x14   :  { %572 = shalt.err (!%p569_p9)
}
  0x15   :  { %24 = dma.hbm_to_vmem [thread:$0]  %s681_s1, 1024, %s19_s18, [#allocation3], %s599_s20, %s599_s20, %s600_s21  }
  0x16   :  { %s601_s27 = smov [#allocation6]  }
  0x17   :  { %s42_s28 = sshll.u32 %s601_s27, 4  ;;  %s43_s28 = int_to_ptr.vmem [resolvable:$true] %s42_s28 }
  0x18   :  { %s581_s29 = scalar_lea.vmem %s43_s28, 1024  ;;  %p586_p11 = scmp.lt.s32.totalorder %s43_s28, %s43_s28 }
  0x19   :  { %p582_p10 = scmp.ne.s32.totalorder %s43_s28, %s581_s29  ;;  %p587_p12 = scmp.lt.s32.totalorder %s581_s29, %s581_s29 }
  0x1b   :  { %p588_p13 = por %p587_p12, %p586_p11 }
  0x1d   :  { %p589_p0 = pnand %p588_p13, %p582_p10 }
  0x1f   :  { %592 = shalt.err (!%p589_p0)
}
  0x20   :  { %48 = dma.hbm_to_vmem [thread:$0]  %s683_s3, 1024, %s43_s28, [#allocation5], %s599_s20, %s599_s20, %s600_s21  }
  0x21   :  { %593 = dma.done.wait [#allocation3], 1024  }
  0x22   :  { %594 = vsyncadd [#allocation3], 4294966272 }
  0x23   :  { %595 = dma.done.wait [#allocation5], 2048  }
  0x24   :  { %596 = vsyncadd [#allocation5], 4294965248  ;;  %v602_v0 = vmov 0.0   ;;  %vm603_vm0 = vmmov 0   ;;  %v509_v1 = vld [vmem:[#allocation2 + $0x38] sm:$0xff]   ;;  %v510_v2 = vld [vmem:[#allocation2 + $0x30] sm:$0xff]  }
  0x25   :  { %442 = vmatprep.subr.bf16.mxu0 %v602_v0  ;;  %458 = vmatprep.mubr.msk.bf16.mxu0 %vm603_vm0, %v602_v0  ;;  %v511_v3 = vld [vmem:[#allocation2 + $0x28] sm:$0xff]   ;;  %v517_v4 = vld [vmem:[#allocation4 + $0x38] sm:$0xff]   ;;  %v512_v5 = vld [vmem:[#allocation2 + $0x20] sm:$0xff]  }
  0x26   :  { %462 = vmatprep.subr.bf16.mxu1 %v602_v0  ;;  %478 = vmatprep.mubr.msk.bf16.mxu1 %vm603_vm0, %v602_v0  ;;  %v518_v6 = vld [vmem:[#allocation4 + $0x30] sm:$0xff]   ;;  %v513_v7 = vld [vmem:[#allocation2 + $0x18] sm:$0xff]   ;;  %v519_v8 = vld [vmem:[#allocation4 + $0x28] sm:$0xff]  }
  0x27   :  { %443 = vmatpush3.bf16.msra.mxu0 %v509_v1  ;;  %463 = vmatpush3.bf16.msra.mxu1 %v517_v4  ;;  %v514_v9 = vld [vmem:[#allocation2 + $0x10] sm:$0xff]   ;;  %v520_v10 = vld [vmem:[#allocation4 + $0x20] sm:$0xff]   ;;  %v515_v11 = vld [vmem:[#allocation2 + $0x8] sm:$0xff]  }
  0x28   :  { %444 = vmatprep.subr.bf16.mxu0 %v602_v0  ;;  %464 = vmatprep.subr.bf16.mxu1 %v602_v0  ;;  %v521_v12 = vld [vmem:[#allocation4 + $0x18] sm:$0xff]   ;;  %v516_v13 = vld [vmem:[#allocation2] sm:$0xff]   ;;  %v60_v15 = vld [vmem:[%s680_s0 + $0x8] sm:$0xff] }
  0x29   :  { %v59_v14 = vld [vmem:[%s680_s0] sm:$0xff]  ;;  %v522_v16 = vld [vmem:[#allocation4 + $0x10] sm:$0xff]   ;;  %v523_v18 = vld [vmem:[#allocation4 + $0x8] sm:$0xff]  }
  0x2a   :  { %v61_v17 = vpack.c.bf16 %v60_v15, %v59_v14  ;;  %v524_v19 = vld [vmem:[#allocation4] sm:$0xff]   ;;  %v525_v20 = vld [vmem:[#allocation6 + $0x38] sm:$0xff]   ;;  %v526_v21 = vld [vmem:[#allocation6 + $0x30] sm:$0xff]  }
  0x2b   :  { %445 = vmatpush3.bf16.msra.mxu0 %v510_v2  ;;  %465 = vmatpush3.bf16.msra.mxu1 %v518_v6  ;;  %v527_v22 = vld [vmem:[#allocation6 + $0x28] sm:$0xff]   ;;  %v528_v23 = vld [vmem:[#allocation6 + $0x20] sm:$0xff]   ;;  %v529_v24 = vld [vmem:[#allocation6 + $0x18] sm:$0xff]  }
  0x2c   :  { %446 = vmatprep.subr.bf16.mxu0 %v602_v0  ;;  %466 = vmatprep.subr.bf16.mxu1 %v602_v0  ;;  %v530_v25 = vld [vmem:[#allocation6 + $0x10] sm:$0xff]   ;;  %v531_v33 = vld [vmem:[#allocation6 + $0x8] sm:$0xff]   ;;  %v532_v34 = vld [vmem:[#allocation6] sm:$0xff]  }
  0x2f   :  { %447 = vmatpush3.bf16.msra.mxu0 %v511_v3  ;;  %467 = vmatpush3.bf16.msra.mxu1 %v519_v8 }
  0x30   :  { %448 = vmatprep.subr.bf16.mxu0 %v602_v0  ;;  %468 = vmatprep.subr.bf16.mxu1 %v602_v0 }
  0x33   :  { %449 = vmatpush3.bf16.msra.mxu0 %v512_v5  ;;  %469 = vmatpush3.bf16.msra.mxu1 %v520_v10 }
  0x34   :  { %450 = vmatprep.subr.bf16.mxu0 %v602_v0  ;;  %470 = vmatprep.subr.bf16.mxu1 %v602_v0 }
  0x37   :  { %451 = vmatpush3.bf16.msra.mxu0 %v513_v7  ;;  %471 = vmatpush3.bf16.msra.mxu1 %v521_v12 }
  0x38   :  { %452 = vmatprep.subr.bf16.mxu0 %v602_v0  ;;  %472 = vmatprep.subr.bf16.mxu1 %v602_v0 }
  0x3b   :  { %453 = vmatpush3.bf16.msra.mxu0 %v514_v9  ;;  %473 = vmatpush3.bf16.msra.mxu1 %v522_v16 }
  0x3c   :  { %454 = vmatprep.subr.bf16.mxu0 %v602_v0  ;;  %474 = vmatprep.subr.bf16.mxu1 %v602_v0 }
  0x3f   :  { %455 = vmatpush3.bf16.msra.mxu0 %v515_v11  ;;  %475 = vmatpush3.bf16.msra.mxu1 %v523_v18 }
  0x40   :  { %456 = vmatprep.subr.bf16.mxu0 %v602_v0  ;;  %476 = vmatprep.subr.bf16.mxu1 %v602_v0 }
  0x43   :  { %457 = vmatpush3.bf16.msra.mxu0 %v516_v13  ;;  %477 = vmatpush3.bf16.msra.mxu1 %v524_v19 }
  0x44   :  { %482 = vmatprep.subr.bf16.mxu0 %v602_v0 }
  0x46   :  { %459 = vmatmul.mubr.bf16.vlgmr.msra.gmra.mxu0 %v61_v17 }
  0x47   :  { %498 = vmatprep.mubr.msk.bf16.mxu0 %vm603_vm0, %v602_v0  ;;  %483 = vmatpush3.bf16.msra.mxu0 %v525_v20 }
  0x48   :  { %484 = vmatprep.subr.bf16.mxu0 %v602_v0 }
  0x4b   :  { %485 = vmatpush3.bf16.msra.mxu0 %v526_v21 }
  0x4c   :  { %486 = vmatprep.subr.bf16.mxu0 %v602_v0 }
  0x4f   :  { %487 = vmatpush3.bf16.msra.mxu0 %v527_v22 }
  0x50   :  { %488 = vmatprep.subr.bf16.mxu0 %v602_v0 }
  0x53   :  { %489 = vmatpush3.bf16.msra.mxu0 %v528_v23 }
  0x54   :  { %490 = vmatprep.subr.bf16.mxu0 %v602_v0 }
  0x57   :  { %491 = vmatpush3.bf16.msra.mxu0 %v529_v24 }
  0x58   :  { %492 = vmatprep.subr.bf16.mxu0 %v602_v0 }
  0x5b   :  { %493 = vmatpush3.bf16.msra.mxu0 %v530_v25 }
  0x5c   :  { %494 = vmatprep.subr.bf16.mxu0 %v602_v0 }
  0x5f   :  { %495 = vmatpush3.bf16.msra.mxu0 %v531_v33 }
  0x60   :  { %496 = vmatprep.subr.bf16.mxu0 %v602_v0 }
  0x63   :  { %497 = vmatpush3.bf16.msra.mxu0 %v532_v34 }
 0x106   :  { %v160_v26 = vpop.f32.mrf.mxu0 }
 0x107   :  { %v167_v29 = vmax.f32 %v160_v26, 0.0 }
 0x108   :  { %v460_v27 = vpop.f32.mrf.mxu0 }
 0x10a   :  { %v163_v28 = vpop.f32.mrf.mxu0 }
 0x10b   :  { %v168_v30 = vmax.f32 %v163_v28, 0.0 }
 0x10c   :  { %v461_v31 = vpop.f32.mrf.mxu0 }
 0x10d   :  { %v169_v32 = vpack.c.bf16 %v168_v30, %v167_v29 }
 0x10f   :  { %479 = vmatmul.mubr.bf16.vlgmr.msra.gmra.mxu1 %v169_v32 }
 0x1cf   :  { %v268_v35 = vpop.f32.mrf.mxu1 }
 0x1d0   :  { %v275_v38 = vmax.f32 %v268_v35, 0.0 }
 0x1d1   :  { %v480_v36 = vpop.f32.mrf.mxu1 }
 0x1d3   :  { %v271_v37 = vpop.f32.mrf.mxu1 }
 0x1d4   :  { %v276_v39 = vmax.f32 %v271_v37, 0.0 }
 0x1d5   :  { %v481_v40 = vpop.f32.mrf.mxu1 }
 0x1d6   :  { %v277_v41 = vpack.c.bf16 %v276_v39, %v275_v38 }
 0x1d8   :  { %499 = vmatmul.mubr.bf16.vlgmr.msra.gmra.mxu0 %v277_v41 }
 0x298   :  { %v376_v42 = vpop.f32.mrf.mxu0 }
 0x299   :  { %383 = vst [vmem:[%s684_s4] sm:$0xff] %v376_v42 }
 0x29a   :  { %v500_v43 = vpop.f32.mrf.mxu0 }
 0x29c   :  { %v379_v44 = vpop.f32.mrf.mxu0 }
 0x29d   :  { %384 = vst [vmem:[%s684_s4 + $0x8] sm:$0xff] %v379_v44 }
 0x29e   :  { %v501_v45 = vpop.f32.mrf.mxu0 }
 0x29f   :  { %389 = vsyncpa [#allocation3], 1 }
 0x2a0   :  { %390 = vsyncpa [#allocation5], 1 }

// kernel: mlp_forward.1
= control target key start
LH: loop header
LB: loop body
LE: loop exit
PB: predicated region body
PF: predicated region fallthrough
CT: control target
= control target key end

     0   :  { %9 = vsyncpa [#allocation3], 0  ;;  %s680_s0 = inlined_call_operand.vmem [shape: f32[16,128], index: 0, kind: input, shape index: {}]   ;;  %s681_s1 = inlined_call_operand.hbm [shape: bf16[128,128], index: 1, kind: input, shape index: {}]   ;;  %s682_s2 = inlined_call_operand.hbm [shape: bf16[128,128], index: 2, kind: input, shape index: {}]   ;;  %s683_s3 = inlined_call_operand.hbm [shape: bf16[128,128], index: 3, kind: input, shape index: {}]   ;;  %s684_s4 = inlined_call_operand.vmem [shape: f32[16,128], index: 4, kind: output, shape index: {}]  }
   0x1   :  { %10 = vsyncpa [#allocation5], 0  ;;  %s597_s15 = smov [#allocation4]   ;;  %s598_s17 = smov [#allocation2]  }
   0x2   :  { %s30_s16 = sshll.u32 %s597_s15, 4  ;;  %s18_s18 = sshll.u32 %s598_s17, 4  ;;  %s31_s16 = int_to_ptr.vmem [resolvable:$true] %s30_s16  ;;  %s19_s18 = int_to_ptr.vmem [resolvable:$true] %s18_s18 }
   0x3   :  { %s541_s19 = scalar_lea.vmem %s31_s16, 1024  ;;  %p546_p1 = scmp.lt.s32.totalorder %s31_s16, %s31_s16 }
   0x4   :  { %p542_p0 = scmp.ne.s32.totalorder %s31_s16, %s541_s19  ;;  %p547_p2 = scmp.lt.s32.totalorder %s541_s19, %s541_s19 }
   0x6   :  { %p548_p3 = por %p547_p2, %p546_p1 }
   0x8   :  { %p549_p4 = pnand %p548_p3, %p542_p0 }
   0xa   :  { %552 = shalt.err (!%p549_p4)
}
   0xb   :  { %s599_s20 = smov 64   ;;  %s600_s21 = smov 4  }
   0xc   :  { %36 = dma.hbm_to_vmem [thread:$0]  %s682_s2, 1024, %s31_s16, [#allocation5], %s599_s20, %s599_s20, %s600_s21  }
   0xd   :  { %s561_s24 = scalar_lea.vmem %s19_s18, 1024  ;;  %p566_p6 = scmp.lt.s32.totalorder %s19_s18, %s19_s18 }
   0xe   :  { %p562_p5 = scmp.ne.s32.totalorder %s19_s18, %s561_s24  ;;  %p567_p7 = scmp.lt.s32.totalorder %s561_s24, %s561_s24 }
  0x10   :  { %p568_p8 = por %p567_p7, %p566_p6 }
  0x12   :  { %p569_p9 = pnand %p568_p8, %p562_p5 }
  0x14   :  { %572 = shalt.err (!%p569_p9)
}
  0x15   :  { %24 = dma.hbm_to_vmem [thread:$0]  %s681_s1, 1024, %s19_s18, [#allocation3], %s599_s20, %s599_s20, %s600_s21  }
  0x16   :  { %s601_s27 = smov [#allocation6]  }
  0x17   :  { %s42_s28 = sshll.u32 %s601_s27, 4  ;;  %s43_s28 = int_to_ptr.vmem [resolvable:$true] %s42_s28 }
  0x18   :  { %s581_s29 = scalar_lea.vmem %s43_s28, 1024  ;;  %p586_p11 = scmp.lt.s32.totalorder %s43_s28, %s43_s28 }
  0x19   :  { %p582_p10 = scmp.ne.s32.totalorder %s43_s28, %s581_s29  ;;  %p587_p12 = scmp.lt.s32.totalorder %s581_s29, %s581_s29 }
  0x1b   :  { %p588_p13 = por %p587_p12, %p586_p11 }
  0x1d   :  { %p589_p0 = pnand %p588_p13, %p582_p10 }
  0x1f   :  { %592 = shalt.err (!%p589_p0)
}
  0x20   :  { %48 = dma.hbm_to_vmem [thread:$0]  %s683_s3, 1024, %s43_s28, [#allocation5], %s599_s20, %s599_s20, %s600_s21  }
  0x21   :  { %593 = dma.done.wait [#allocation3], 1024  }
  0x22   :  { %594 = vsyncadd [#allocation3], 4294966272 }
  0x23   :  { %595 = dma.done.wait [#allocation5], 2048  }
  0x24   :  { %596 = vsyncadd [#allocation5], 4294965248  ;;  %v602_v0 = vmov 0.0   ;;  %vm603_vm0 = vmmov 0   ;;  %v509_v1 = vld [vmem:[#allocation2 + $0x38] sm:$0xff]   ;;  %v510_v2 = vld [vmem:[#allocation2 + $0x30] sm:$0xff]  }
  0x25   :  { %442 = vmatprep.subr.bf16.mxu0 %v602_v0  ;;  %458 = vmatprep.mubr.msk.bf16.mxu0 %vm603_vm0, %v602_v0  ;;  %v511_v3 = vld [vmem:[#allocation2 + $0x28] sm:$0xff]   ;;  %v517_v4 = vld [vmem:[#allocation4 + $0x38] sm:$0xff]   ;;  %v512_v5 = vld [vmem:[#allocation2 + $0x20] sm:$0xff]  }
  0x26   :  { %462 = vmatprep.subr.bf16.mxu1 %v602_v0  ;;  %478 = vmatprep.mubr.msk.bf16.mxu1 %vm603_vm0, %v602_v0  ;;  %v518_v6 = vld [vmem:[#allocation4 + $0x30] sm:$0xff]   ;;  %v513_v7 = vld [vmem:[#allocation2 + $0x18] sm:$0xff]   ;;  %v519_v8 = vld [vmem:[#allocation4 + $0x28] sm:$0xff]  }
  0x27   :  { %443 = vmatpush3.bf16.msra.mxu0 %v509_v1  ;;  %463 = vmatpush3.bf16.msra.mxu1 %v517_v4  ;;  %v514_v9 = vld [vmem:[#allocation2 + $0x10] sm:$0xff]   ;;  %v520_v10 = vld [vmem:[#allocation4 + $0x20] sm:$0xff]   ;;  %v515_v11 = vld [vmem:[#allocation2 + $0x8] sm:$0xff]  }
  0x28   :  { %444 = vmatprep.subr.bf16.mxu0 %v602_v0  ;;  %464 = vmatprep.subr.bf16.mxu1 %v602_v0  ;;  %v521_v12 = vld [vmem:[#allocation4 + $0x18] sm:$0xff]   ;;  %v516_v13 = vld [vmem:[#allocation2] sm:$0xff]   ;;  %v60_v15 = vld [vmem:[%s680_s0 + $0x8] sm:$0xff] }
  0x29   :  { %v59_v14 = vld [vmem:[%s680_s0] sm:$0xff]  ;;  %v522_v16 = vld [vmem:[#allocation4 + $0x10] sm:$0xff]   ;;  %v523_v18 = vld [vmem:[#allocation4 + $0x8] sm:$0xff]  }
  0x2a   :  { %v61_v17 = vpack.c.bf16 %v60_v15, %v59_v14  ;;  %v524_v19 = vld [vmem:[#allocation4] sm:$0xff]   ;;  %v525_v20 = vld [vmem:[#allocation6 + $0x38] sm:$0xff]   ;;  %v526_v21 = vld [vmem:[#allocation6 + $0x30] sm:$0xff]  }
  0x2b   :  { %445 = vmatpush3.bf16.msra.mxu0 %v510_v2  ;;  %465 = vmatpush3.bf16.msra.mxu1 %v518_v6  ;;  %v527_v22 = vld [vmem:[#allocation6 + $0x28] sm:$0xff]   ;;  %v528_v23 = vld [vmem:[#allocation6 + $0x20] sm:$0xff]   ;;  %v529_v24 = vld [vmem:[#allocation6 + $0x18] sm:$0xff]  }
  0x2c   :  { %446 = vmatprep.subr.bf16.mxu0 %v602_v0  ;;  %466 = vmatprep.subr.bf16.mxu1 %v602_v0  ;;  %v530_v25 = vld [vmem:[#allocation6 + $0x10] sm:$0xff]   ;;  %v531_v33 = vld [vmem:[#allocation6 + $0x8] sm:$0xff]   ;;  %v532_v34 = vld [vmem:[#allocation6] sm:$0xff]  }
  0x2f   :  { %447 = vmatpush3.bf16.msra.mxu0 %v511_v3  ;;  %467 = vmatpush3.bf16.msra.mxu1 %v519_v8 }
  0x30   :  { %448 = vmatprep.subr.bf16.mxu0 %v602_v0  ;;  %468 = vmatprep.subr.bf16.mxu1 %v602_v0 }
  0x33   :  { %449 = vmatpush3.bf16.msra.mxu0 %v512_v5  ;;  %469 = vmatpush3.bf16.msra.mxu1 %v520_v10 }
  0x34   :  { %450 = vmatprep.subr.bf16.mxu0 %v602_v0  ;;  %470 = vmatprep.subr.bf16.mxu1 %v602_v0 }
  0x37   :  { %451 = vmatpush3.bf16.msra.mxu0 %v513_v7  ;;  %471 = vmatpush3.bf16.msra.mxu1 %v521_v12 }
  0x38   :  { %452 = vmatprep.subr.bf16.mxu0 %v602_v0  ;;  %472 = vmatprep.subr.bf16.mxu1 %v602_v0 }
  0x3b   :  { %453 = vmatpush3.bf16.msra.mxu0 %v514_v9  ;;  %473 = vmatpush3.bf16.msra.mxu1 %v522_v16 }
  0x3c   :  { %454 = vmatprep.subr.bf16.mxu0 %v602_v0  ;;  %474 = vmatprep.subr.bf16.mxu1 %v602_v0 }
  0x3f   :  { %455 = vmatpush3.bf16.msra.mxu0 %v515_v11  ;;  %475 = vmatpush3.bf16.msra.mxu1 %v523_v18 }
  0x40   :  { %456 = vmatprep.subr.bf16.mxu0 %v602_v0  ;;  %476 = vmatprep.subr.bf16.mxu1 %v602_v0 }
  0x43   :  { %457 = vmatpush3.bf16.msra.mxu0 %v516_v13  ;;  %477 = vmatpush3.bf16.msra.mxu1 %v524_v19 }
  0x44   :  { %482 = vmatprep.subr.bf16.mxu0 %v602_v0 }
  0x46   :  { %459 = vmatmul.mubr.bf16.vlgmr.msra.gmra.mxu0 %v61_v17 }
  0x47   :  { %498 = vmatprep.mubr.msk.bf16.mxu0 %vm603_vm0, %v602_v0  ;;  %483 = vmatpush3.bf16.msra.mxu0 %v525_v20 }
  0x48   :  { %484 = vmatprep.subr.bf16.mxu0 %v602_v0 }
  0x4b   :  { %485 = vmatpush3.bf16.msra.mxu0 %v526_v21 }
  0x4c   :  { %486 = vmatprep.subr.bf16.mxu0 %v602_v0 }
  0x4f   :  { %487 = vmatpush3.bf16.msra.mxu0 %v527_v22 }
  0x50   :  { %488 = vmatprep.subr.bf16.mxu0 %v602_v0 }
  0x53   :  { %489 = vmatpush3.bf16.msra.mxu0 %v528_v23 }
  0x54   :  { %490 = vmatprep.subr.bf16.mxu0 %v602_v0 }
  0x57   :  { %491 = vmatpush3.bf16.msra.mxu0 %v529_v24 }
  0x58   :  { %492 = vmatprep.subr.bf16.mxu0 %v602_v0 }
  0x5b   :  { %493 = vmatpush3.bf16.msra.mxu0 %v530_v25 }
  0x5c   :  { %494 = vmatprep.subr.bf16.mxu0 %v602_v0 }
  0x5f   :  { %495 = vmatpush3.bf16.msra.mxu0 %v531_v33 }
  0x60   :  { %496 = vmatprep.subr.bf16.mxu0 %v602_v0 }
  0x63   :  { %497 = vmatpush3.bf16.msra.mxu0 %v532_v34 }
 0x106   :  { %v160_v26 = vpop.f32.mrf.mxu0 }
 0x107   :  { %v167_v29 = vmax.f32 %v160_v26, 0.0 }
 0x108   :  { %v460_v27 = vpop.f32.mrf.mxu0 }
 0x10a   :  { %v163_v28 = vpop.f32.mrf.mxu0 }
 0x10b   :  { %v168_v30 = vmax.f32 %v163_v28, 0.0 }
 0x10c   :  { %v461_v31 = vpop.f32.mrf.mxu0 }
 0x10d   :  { %v169_v32 = vpack.c.bf16 %v168_v30, %v167_v29 }
 0x10f   :  { %479 = vmatmul.mubr.bf16.vlgmr.msra.gmra.mxu1 %v169_v32 }
 0x1cf   :  { %v268_v35 = vpop.f32.mrf.mxu1 }
 0x1d0   :  { %v275_v38 = vmax.f32 %v268_v35, 0.0 }
 0x1d1   :  { %v480_v36 = vpop.f32.mrf.mxu1 }
 0x1d3   :  { %v271_v37 = vpop.f32.mrf.mxu1 }
 0x1d4   :  { %v276_v39 = vmax.f32 %v271_v37, 0.0 }
 0x1d5   :  { %v481_v40 = vpop.f32.mrf.mxu1 }
 0x1d6   :  { %v277_v41 = vpack.c.bf16 %v276_v39, %v275_v38 }
 0x1d8   :  { %499 = vmatmul.mubr.bf16.vlgmr.msra.gmra.mxu0 %v277_v41 }
 0x298   :  { %v376_v42 = vpop.f32.mrf.mxu0 }
 0x299   :  { %383 = vst [vmem:[%s684_s4] sm:$0xff] %v376_v42 }
 0x29a   :  { %v500_v43 = vpop.f32.mrf.mxu0 }
 0x29c   :  { %v379_v44 = vpop.f32.mrf.mxu0 }
 0x29d   :  { %384 = vst [vmem:[%s684_s4 + $0x8] sm:$0xff] %v379_v44 }
 0x29e   :  { %v501_v45 = vpop.f32.mrf.mxu0 }
 0x29f   :  { %389 = vsyncpa [#allocation3], 1 }
 0x2a0   :  { %390 = vsyncpa [#allocation5], 1 }

</bundles_post_ra>
